<compile_context>
chip_gen: v5e
topology: v5e:2x2
jax: 0.10.0
libtpu: 0.0.40
codegen_flags: <defaults>
</compile_context>

<pallas_src>
import jax
import jax.numpy as jnp
from jax.experimental import pallas as pl
from jax.experimental.pallas import tpu as pltpu

_LANES = 128
_MAX_TILE_ROWS = 2048   # 2048 x 128 x 4 B = 1 MiB per block per stream


def _round_up(n, m):
    return ((n + m - 1) // m) * m


def _prelu_kernel(alpha_ref, xr_ref, xi_ref, yr_ref, yi_ref):
    # alpha_ref: (1, 1) f32 scalar in SMEM
    # xr_ref/xi_ref/yr_ref/yi_ref: (tile_r, 128) f32 VMEM
    a = alpha_ref[0, 0]
    xr = xr_ref[...]
    xi = xi_ref[...]
    yr_ref[...] = jnp.where(xr >= 0, xr, a * xr)
    yi_ref[...] = jnp.where(xi >= 0, xi, a * xi)


@jax.jit
def complex_prelu(x, alpha):
    """ComplexPReLU forward: complex(prelu(x.real), prelu(x.imag)).

    x: complex64 array of any shape. alpha: scalar float32 (single PReLU
    weight, i.e. nn.PReLU(num_parameters=1)). Returns complex64, same shape.
    """
    orig_shape = x.shape
    n = x.size                                        # complex elements (static)

    # Separate lane-dense f32 planes (no concatenate, no output split).
    xr = jnp.real(x).reshape(-1)                      # (n,) float32
    xi = jnp.imag(x).reshape(-1)                      # (n,) float32

    rows = pl.cdiv(n, _LANES)                         # rows of 128 lanes needed

    # Balanced tiling: split rows into near-equal blocks, >= 2 blocks when
    # there is enough data (so both v7x TensorCores get work); padding waste
    # is < one 8-row group per block.
    if rows > 8:
        num_blocks = max(pl.cdiv(rows, _MAX_TILE_ROWS), 2)
    else:
        num_blocks = 1
    tile_r = _round_up(pl.cdiv(rows, num_blocks), 8)  # multiple of 8 sublanes
    rows_p = tile_r * num_blocks
    padded = rows_p * _LANES

    if padded != n:
        pad = padded - n
        xr = jnp.pad(xr, (0, pad))                    # PReLU(0) == 0, safe
        xi = jnp.pad(xi, (0, pad))
    xr2 = xr.reshape(rows_p, _LANES)
    xi2 = xi.reshape(rows_p, _LANES)

    alpha_arr = jnp.asarray(alpha, jnp.float32).reshape(1, 1)
    block = pl.BlockSpec((tile_r, _LANES), lambda i: (i, 0))

    yr2, yi2 = pl.pallas_call(
        _prelu_kernel,
        out_shape=(
            jax.ShapeDtypeStruct((rows_p, _LANES), jnp.float32),
            jax.ShapeDtypeStruct((rows_p, _LANES), jnp.float32),
        ),
        grid=(num_blocks,),
        in_specs=[
            pl.BlockSpec(memory_space=pltpu.SMEM),    # alpha scalar
            block,                                     # real plane
            block,                                     # imag plane
        ],
        out_specs=(block, block),
        input_output_aliases={1: 0, 2: 1},            # elementwise: reuse buffers
        compiler_params=pltpu.CompilerParams(
            dimension_semantics=("parallel",)),        # shard blocks across TCs
    )(alpha_arr, xr2, xi2)

    yr = yr2.reshape(-1)
    yi = yi2.reshape(-1)
    if padded != n:
        yr = yr[:n]
        yi = yi[:n]
    return jax.lax.complex(yr.reshape(orig_shape), yi.reshape(orig_shape))


if __name__ == "__main__":
    key = jax.random.PRNGKey(0)
    kr, ki = jax.random.split(key)

    # small NCHW-like complex input: (B=2, C=4, H=16, W=16)
    B, C, H, W = 2, 4, 16, 16
    xr = jax.random.normal(kr, (B, C, H, W), dtype=jnp.float32)
    xi = jax.random.normal(ki, (B, C, H, W), dtype=jnp.float32)
    x = jax.lax.complex(xr, xi)  # complex64

    # deterministic parameter init: PyTorch nn.PReLU() default alpha = 0.25
    alpha = jnp.float32(0.25)

    y = complex_prelu(x, alpha)
    y = jax.block_until_ready(y)

    # reference check in plain JAX
    ref_r = jnp.where(xr >= 0, xr, alpha * xr)
    ref_i = jnp.where(xi >= 0, xi, alpha * xi)
    assert y.dtype == jnp.complex64
    assert y.shape == (B, C, H, W)
    assert jnp.allclose(jnp.real(y), ref_r, atol=1e-6)
    assert jnp.allclose(jnp.imag(y), ref_i, atol=1e-6)

    print("KERNEL_OK")
</pallas_src>

<mosaic_0001>
module attributes {stable_mosaic.version = 11 : i64} {
  func.func @_prelu_kernel(%arg0: i32, %arg1: memref<1x1xf32, #tpu.memory_space<smem>>, %arg2: memref<8x128xf32, #tpu.memory_space<vmem>>, %arg3: memref<8x128xf32, #tpu.memory_space<vmem>>, %arg4: memref<8x128xf32, #tpu.memory_space<vmem>>, %arg5: memref<8x128xf32, #tpu.memory_space<vmem>>) attributes {dimension_semantics = [#tpu.dimension_semantics<parallel>], iteration_bounds = array<i64: 2>, scalar_prefetch = 0 : i64, scratch_operands = 0 : i64, tpu.core_type = #tpu.core_type<tc>, window_params = [{transform_indices = @transform_0, window_bounds = array<i64: 1, 1>}, {transform_indices = @transform_1, window_bounds = array<i64: 8, 128>}, {transform_indices = @transform_2, window_bounds = array<i64: 8, 128>}, {transform_indices = @transform_3, window_bounds = array<i64: 8, 128>}, {transform_indices = @transform_4, window_bounds = array<i64: 8, 128>}]} {
    %c0 = arith.constant 0 : index
    %c0_0 = arith.constant 0 : index
    %0 = memref.load %arg1[%c0, %c0_0] : memref<1x1xf32, #tpu.memory_space<smem>>
    %c0_1 = arith.constant 0 : index
    %c0_2 = arith.constant 0 : index
    %1 = vector.load %arg2[%c0_1, %c0_2] : memref<8x128xf32, #tpu.memory_space<vmem>>, vector<8x128xf32>
    %c0_3 = arith.constant 0 : index
    %c0_4 = arith.constant 0 : index
    %2 = vector.load %arg3[%c0_3, %c0_4] : memref<8x128xf32, #tpu.memory_space<vmem>>, vector<8x128xf32>
    %cst = arith.constant 0.000000e+00 : f32
    %3 = vector.broadcast %cst : f32 to vector<8x128xf32>
    %4 = arith.cmpf oge, %1, %3 : vector<8x128xf32>
    %5 = vector.broadcast %0 : f32 to vector<8x128xf32>
    %6 = arith.mulf %5, %1 : vector<8x128xf32>
    %7 = arith.select %4, %1, %6 : vector<8x128xi1>, vector<8x128xf32>
    %c0_5 = arith.constant 0 : index
    %c0_6 = arith.constant 0 : index
    %8 = vector.load %arg4[%c0_5, %c0_6] : memref<8x128xf32, #tpu.memory_space<vmem>>, vector<8x128xf32>
    tpu.vector_store %arg4[%c0_5, %c0_6], %7 {strides = array<i32>} : memref<8x128xf32, #tpu.memory_space<vmem>>, vector<8x128xf32>,
    %cst_7 = arith.constant 0.000000e+00 : f32
    %9 = vector.broadcast %cst_7 : f32 to vector<8x128xf32>
    %10 = arith.cmpf oge, %2, %9 : vector<8x128xf32>
    %11 = vector.broadcast %0 : f32 to vector<8x128xf32>
    %12 = arith.mulf %11, %2 : vector<8x128xf32>
    %13 = arith.select %10, %2, %12 : vector<8x128xi1>, vector<8x128xf32>
    %c0_8 = arith.constant 0 : index
    %c0_9 = arith.constant 0 : index
    %14 = vector.load %arg5[%c0_8, %c0_9] : memref<8x128xf32, #tpu.memory_space<vmem>>, vector<8x128xf32>
    tpu.vector_store %arg5[%c0_8, %c0_9], %13 {strides = array<i32>} : memref<8x128xf32, #tpu.memory_space<vmem>>, vector<8x128xf32>,
    return
  }
  func.func @transform_0(%arg0: i32) -> (i32, i32) {
    %c0_i32 = arith.constant 0 : i32
    %c0_i32_0 = arith.constant 0 : i32
    %c0_i32_1 = arith.constant 0 : i32
    return %c0_i32, %c0_i32_0 : i32, i32
  }
  func.func @transform_1(%arg0: i32) -> (i32, i32) {
    %c0_i32 = arith.constant 0 : i32
    %c0_i32_0 = arith.constant 0 : i32
    return %arg0, %c0_i32 : i32, i32
  }
  func.func @transform_2(%arg0: i32) -> (i32, i32) {
    %c0_i32 = arith.constant 0 : i32
    %c0_i32_0 = arith.constant 0 : i32
    return %arg0, %c0_i32 : i32, i32
  }
  func.func @transform_3(%arg0: i32) -> (i32, i32) {
    %c0_i32 = arith.constant 0 : i32
    %c0_i32_0 = arith.constant 0 : i32
    return %arg0, %c0_i32 : i32, i32
  }
  func.func @transform_4(%arg0: i32) -> (i32, i32) {
    %c0_i32 = arith.constant 0 : i32
    %c0_i32_0 = arith.constant 0 : i32
    return %arg0, %c0_i32 : i32, i32
  }
}

</mosaic_0001>

<bundles_post_ra>
// kernel: custom-call.1
= control target key start
LH: loop header
LB: loop body
LE: loop exit
PB: predicated region body
PF: predicated region fallthrough
CT: control target
= control target key end

     0   :  { %s56_s0 = inlined_call_operand.hbm [shape: c64[2,4,16,16], index: 0, kind: input, shape index: {}]   ;;  %s57_s1 = inlined_call_operand.vmem [shape: f32[2,4,16,16], index: 1, kind: output, shape index: {}]  }
   0x1   :  { %s2_s8 = scalar_lea.hbm %s56_s0, 128 }
   0x2   :  { %3 = vsyncpa [#allocation0], 0  ;;  %s5_s9 = sshll.u32 %s2_s8, 4  ;;  %s7_s12 = sshll.u32 %s57_s1, 4  ;;  %s6_s9 = int_to_ptr.hbm [resolvable:$true] %s5_s9  ;;  %s8_s12 = int_to_ptr.vmem [resolvable:$true] %s7_s12 }
   0x3   :  { %10 = dma.hbm_to_vmem [thread:$0]  %s6_s9, 2048, %s8_s12, [#allocation0] }
   0x4   :  { %38 = dma.done.wait [#allocation0], 2048  }
   0x5   :  { %39 = vsyncadd [#allocation0], 4294965248 }
   0x6   :  { %13 = vsyncpa [#allocation0], 1 }

// kernel: custom-call
= control target key start
LH: loop header
LB: loop body
LE: loop exit
PB: predicated region body
PF: predicated region fallthrough
CT: control target
= control target key end

     0   :  { %2 = vsyncpa [#allocation0], 0  ;;  %s55_s0 = inlined_call_operand.hbm [shape: c64[2,4,16,16], index: 0, kind: input, shape index: {}]   ;;  %s56_s1 = inlined_call_operand.vmem [shape: f32[2,4,16,16], index: 1, kind: output, shape index: {}]  }
   0x1   :  { %s4_s8 = sshll.u32 %s55_s0, 4  ;;  %s6_s11 = sshll.u32 %s56_s1, 4  ;;  %s5_s8 = int_to_ptr.hbm [resolvable:$true] %s4_s8  ;;  %s7_s11 = int_to_ptr.vmem [resolvable:$true] %s6_s11 }
   0x2   :  { %9 = dma.hbm_to_vmem [thread:$0]  %s5_s8, 2048, %s7_s11, [#allocation0] }
   0x3   :  { %37 = dma.done.wait [#allocation0], 2048  }
   0x4   :  { %38 = vsyncadd [#allocation0], 4294965248 }
   0x5   :  { %12 = vsyncpa [#allocation0], 1 }

// kernel: custom-call.2
= control target key start
LH: loop header
LB: loop body
LE: loop exit
PB: predicated region body
PF: predicated region fallthrough
CT: control target
= control target key end

     0   :  { %s105_s0 = inlined_call_operand.vmem [shape: f32[2,4,16,16], index: 0, kind: input, shape index: {}]   ;;  %s106_s1 = inlined_call_operand.vmem [shape: f32[2,4,16,16], index: 1, kind: input, shape index: {}]   ;;  %s107_s2 = inlined_call_operand.hbm [shape: c64[2,4,16,16], index: 2, kind: output, shape index: {}]  }
   0x1   :  { %s3_s11 = scalar_lea.hbm %s107_s2, 128 }
   0x2   :  { %4 = vsyncpa [#allocation0], 0  ;;  %s6_s14 = sshll.u32 %s105_s0, 4  ;;  %s8_s17 = sshll.u32 %s107_s2, 4  ;;  %s7_s14 = int_to_ptr.vmem [resolvable:$true] %s6_s14  ;;  %s9_s17 = int_to_ptr.hbm [resolvable:$true] %s8_s17 }
   0x3   :  { %11 = dma.vmem_to_hbm [thread:$0]  %s7_s14, 2048, %s9_s17, [#allocation0] }
   0x4   :  { %74 = dma.done.wait [#allocation0], 2048  }
   0x5   :  { %75 = vsyncadd [#allocation0], 4294965248 }
   0x6   :  { %14 = vsyncpa [#allocation0], 1 }
   0x7   :  { %15 = vsyncpa [#allocation1], 0  ;;  %s17_s20 = sshll.u32 %s106_s1, 4  ;;  %s19_s21 = sshll.u32 %s3_s11, 4  ;;  %s18_s20 = int_to_ptr.vmem [resolvable:$true] %s17_s20  ;;  %s20_s21 = int_to_ptr.hbm [resolvable:$true] %s19_s21 }
   0x8   :  { %22 = dma.vmem_to_hbm [thread:$0]  %s18_s20, 2048, %s20_s21, [#allocation1] }
   0x9   :  { %76 = dma.done.wait [#allocation1], 2048  }
   0xa   :  { %77 = vsyncadd [#allocation1], 4294965248 }
   0xb   :  { %25 = vsyncpa [#allocation1], 1 }

// kernel: complex_prelu.1
= control target key start
LH: loop header
LB: loop body
LE: loop exit
PB: predicated region body
PF: predicated region fallthrough
CT: control target
= control target key end

     0   :  { %s385_s17 = smov 0   ;;  %s402_s0 = inlined_call_operand.<no memory space> [shape: f32[1,1], index: 0, kind: input, shape index: {}]   ;;  %s403_s1 = inlined_call_operand.vmem [shape: f32[16,128], index: 1, kind: input, shape index: {}, may-alias: {1,3}]   ;;  %s404_s2 = inlined_call_operand.vmem [shape: f32[16,128], index: 2, kind: input, shape index: {}, may-alias: {2,4}]   ;;  %s405_s3 = inlined_call_operand.vmem [shape: f32[16,128], index: 3, kind: output, shape index: {0}, may-alias: {1,3}]   ;;  %s406_s4 = inlined_call_operand.vmem [shape: f32[16,128], index: 4, kind: output, shape index: {1}, may-alias: {2,4}]  }
   0x1   :  { %10 = sst [smem:[#allocation2]] %s402_s0 }
   0x2 LB: > { %s330_s18 = sadd.s32 4294967295, %s355_s17   ;;  %p334_p0 = scmp.ge.s32.totalorder %s355_s17, 1  ;;  %s355_s17 = sphi %s385_s17, %s16_s17  }
   0x3   : > { %p174_p1 = scmp.lt.s32.totalorder %s355_s17, 3 }
   0x5   : > { %p175_p2 = pnand %p334_p0, %p174_p1 }
   0x6   : > { %p206_p3 = scmp.lt.s32.totalorder (!%p175_p2), %s330_s18, 1  ;;  %s222_s19 = sld [smem:[#allocation2]] (!%p175_p2) }
   0x7   : > { %178 = sbr.rel (%p175_p2) target bundleno = 21 (0x15), region = 32 }
   0xc   : > { %s408_s18 = smov (!%p206_p3, %s330_s18), 1  ;;  %v226_v1 = vstv %s222_s19 }
   0xd   : > { %s335_s20 = sshll.u32 %s408_s18, 3 }
   0xe   : > { %s209_s23 = scalar_lea.vmem %s403_s1, %s335_s20  ;;  %s213_s25 = scalar_lea.vmem %s404_s2, %s335_s20 }
   0xf   : > { %v223_v0 = vld [vmem:[%s209_s23] sm:$0xff]  ;;  %s217_s28 = scalar_lea.vmem %s405_s3, %s335_s20  ;;  %s221_s5 = scalar_lea.vmem %s406_s4, %s335_s20 }
  0x10   : > { %vm225_vm0 = vcmp.ge.f32.partialorder %v223_v0, 0.0  ;;  %v227_v2 = vmul.f32 %v226_v1, %v223_v0  ;;  %v224_v3 = vld [vmem:[%s213_s25] sm:$0xff] }
  0x11   : > { %vm230_vm1 = vcmp.ge.f32.partialorder %v224_v3, 0.0  ;;  %v231_v4 = vmul.f32 %v226_v1, %v224_v3 }
  0x12   : > { %v228_v5 = vsel %vm225_vm0, %v223_v0, %v227_v2 }
  0x13   : > { %229 = vst [vmem:[%s217_s28] sm:$0xff] %v228_v5  ;;  %v232_v6 = vsel %vm230_vm1, %v224_v3, %v231_v4 }
  0x14   : > { %233 = vst [vmem:[%s221_s5] sm:$0xff] %v232_v6 }
  0x15 PF: > { %s16_s17 = sadd.s32 1, %s355_s17  }
  0x16   : > { %p13_p4 = scmp.ge.s32.totalorder %s16_s17, 4  }
  0x18   :  { %15 = sbr.rel (!%p13_p4) target bundleno = 2 (0x2), region = 77 }

</bundles_post_ra>
